<compile_context>
chip_gen: v5e
topology: v5e:2x2
jax: 0.10.0
libtpu: 0.0.40
codegen_flags: <defaults>
</compile_context>

<pallas_src>
import functools

import jax
import jax.numpy as jnp
from jax.experimental import pallas as pl
from jax.experimental.pallas import tpu as pltpu


def _round_up(x, m):
    return (x + m - 1) // m * m


def r_autorec_kernel(x_ref, w0_ref, b0_ref, w1_ref, b1_ref, wd_ref, bd_ref,
                     out_ref, *, fast_sigmoid):
    # x tile: (TB, in_features) f32.  Weights bf16; biases f32.
    x = x_ref[...].astype(jnp.bfloat16)

    # Encoder layer 0: Linear + f (sigmoid).  f32 accumulate / bias / sigmoid.
    h0 = jnp.dot(x, w0_ref[...], preferred_element_type=jnp.float32) + b0_ref[...]
    h0 = jax.nn.sigmoid(h0)

    # Encoder last layer: raw Linear (raw_last_layer=True), f applied outside.
    h1 = jnp.dot(h0.astype(jnp.bfloat16), w1_ref[...],
                 preferred_element_type=jnp.float32) + b1_ref[...]
    u = jax.nn.sigmoid(h1)

    # Decoder Linear over this TN-wide slice of n_movies + output sigmoid.
    logits = jnp.dot(u.astype(jnp.bfloat16), wd_ref[...],
                     preferred_element_type=jnp.float32) + bd_ref[...]

    if fast_sigmoid:
        # v6e/v7x: bf16 EUP path, single tanh push per element.
        # sigmoid(x) == 0.5 * tanh(0.5 * x) + 0.5
        y = 0.5 * jnp.tanh(0.5 * logits.astype(jnp.bfloat16)) + 0.5
    else:
        # v5e: no bf16 EUP/VPU path -> keep sigmoid in f32, cast at the store.
        y = jax.nn.sigmoid(logits)
    out_ref[...] = y.astype(out_ref.dtype)


def _device_defaults():
    """Per-generation tile / VMEM / EUP-precision defaults."""
    try:
        kind = jax.devices()[0].device_kind.lower()
    except Exception:  # pragma: no cover - defensive
        kind = ""
    if "v5" in kind:
        # Lowest HBM BW -> big tiles matter most; raise the ~16 MiB default
        # scoped-VMEM limit.  No bf16 EUP -> f32 sigmoid.
        return dict(tb=256, tn=4096, fast_sigmoid=False, vmem_limit_bytes=64 << 20)
    if "v6" in kind:
        # 128 MiB VMEM: largest lane-dense tiles; bf16 EUP available.
        return dict(tb=512, tn=8192, fast_sigmoid=True, vmem_limit_bytes=64 << 20)
    if "v7" in kind or "7x" in kind or "tpu7" in kind:
        # 64 MiB VMEM / TC: keep double-buffered footprint well under half
        # of physical (bf16 out tile 256x8192x2B = 4 MiB, x2 buffers).
        return dict(tb=256, tn=8192, fast_sigmoid=True, vmem_limit_bytes=40 << 20)
    # Unknown TPU: conservative.
    return dict(tb=256, tn=4096, fast_sigmoid=False, vmem_limit_bytes=48 << 20)


@functools.partial(
    jax.jit, static_argnames=("tb", "tn", "fast_sigmoid", "vmem_limit_bytes"))
def _r_autorec_forward_impl(x, w0, b0, w1, b1, wd, bd, *, tb, tn, fast_sigmoid,
                            vmem_limit_bytes):
    batch, in_features = x.shape
    h0_dim = w0.shape[1]
    h1_dim = w1.shape[1]
    n_movies = wd.shape[1]

    # ---- batch tiling: multiples of 16 sublanes (bf16 output packing) ------
    b_pad = _round_up(batch, 16)
    tb = max(16, min(_round_up(tb, 16), b_pad))
    if b_pad != batch:
        x = jnp.pad(x, ((0, b_pad - batch), (0, 0)))

    # ---- n_movies tiling: lane-dense (multiple of 512), evenly split so the
    # last tile is never ragged/masked; padded columns are sliced off below.
    n_lane = _round_up(max(n_movies, 512), 512)
    j_tiles = pl.cdiv(n_lane, max(_round_up(tn, 512), 512))
    tn = _round_up(pl.cdiv(n_lane, j_tiles), 512)
    n_pad = tn * j_tiles
    if n_pad != n_movies:
        wd = jnp.pad(wd, ((0, 0), (0, n_pad - n_movies)))
        bd = jnp.pad(bd, ((0, 0), (0, n_pad - n_movies)))

    grid = (pl.cdiv(b_pad, tb), j_tiles)

    # Advisory cost model: decoder matmul + per-j-tile encoder recompute,
    # bf16 output writeback dominates bytes_accessed.
    cost = pl.CostEstimate(
        flops=int(2 * b_pad * n_pad * h1_dim
                  + 2 * b_pad * (in_features * h0_dim + h0_dim * h1_dim) * j_tiles),
        transcendentals=int(b_pad * n_pad + b_pad * (h0_dim + h1_dim) * j_tiles),
        bytes_accessed=int(b_pad * in_features * 4
                           + grid[0] * h1_dim * n_pad * 2
                           + b_pad * n_pad * 2),
    )

    out = pl.pallas_call(
        functools.partial(r_autorec_kernel, fast_sigmoid=fast_sigmoid),
        out_shape=jax.ShapeDtypeStruct((b_pad, n_pad), jnp.bfloat16),
        grid=grid,
        in_specs=[
            # Activations: one batch-tile per i, reused across all j.
            pl.BlockSpec((tb, in_features), lambda i, j: (i, 0)),
            # Encoder weights/biases: tiny, resident across the whole grid.
            pl.BlockSpec((in_features, h0_dim), lambda i, j: (0, 0)),
            pl.BlockSpec((1, h0_dim), lambda i, j: (0, 0)),
            pl.BlockSpec((h0_dim, h1_dim), lambda i, j: (0, 0)),
            pl.BlockSpec((1, h1_dim), lambda i, j: (0, 0)),
            # Decoder weight/bias: one lane-dense TN-wide slice per j.
            pl.BlockSpec((h1_dim, tn), lambda i, j: (0, j)),
            pl.BlockSpec((1, tn), lambda i, j: (0, j)),
        ],
        out_specs=pl.BlockSpec((tb, tn), lambda i, j: (i, j)),
        compiler_params=pltpu.CompilerParams(
            # Both axes independent -> megacore sharding on v7x; near-zero
            # cost on single-TC v5e/v6e.
            dimension_semantics=("parallel", "parallel"),
            vmem_limit_bytes=int(vmem_limit_bytes),
        ),
        cost_estimate=cost,
    )(x, w0, b0, w1, b1, wd, bd)

    # Slice off batch / n_movies padding.
    return out[:batch, :n_movies]


def r_autorec_forward(x, w0, b0, w1, b1, wd, bd, *, tb=None, tn=None,
                      fast_sigmoid=None, vmem_limit_bytes=None):
    """x: (B, in_features) f32; w*: (in, out) bf16; b*: (1, out) f32.

    Returns (B, n_movies) bfloat16 recommendation scores in (0, 1).
    """
    d = _device_defaults()
    return _r_autorec_forward_impl(
        x, w0, b0, w1, b1, wd, bd,
        tb=int(tb if tb is not None else d["tb"]),
        tn=int(tn if tn is not None else d["tn"]),
        fast_sigmoid=bool(fast_sigmoid if fast_sigmoid is not None
                          else d["fast_sigmoid"]),
        vmem_limit_bytes=int(vmem_limit_bytes if vmem_limit_bytes is not None
                             else d["vmem_limit_bytes"]),
    )


def reference_forward_mixed(x, w0, b0, w1, b1, wd, bd):
    # Mirrors the kernel's mixed precision (bf16 matmul operands, f32 acc).
    def mm(a, w):
        return jnp.dot(a.astype(jnp.bfloat16), w.astype(jnp.bfloat16),
                       preferred_element_type=jnp.float32)

    h0 = jax.nn.sigmoid(mm(x, w0) + b0)
    u = jax.nn.sigmoid(mm(h0, w1) + b1)
    return jax.nn.sigmoid(mm(u, wd) + bd)


def reference_forward_f32(x, w0, b0, w1, b1, wd, bd):
    # True full-precision PyTorch math (f32 throughout).
    h0 = jax.nn.sigmoid(x @ w0 + b0)
    u = jax.nn.sigmoid(h0 @ w1 + b1)
    return jax.nn.sigmoid(u @ wd + bd)


if __name__ == "__main__":
    # Small, module-consistent shapes:
    #   conversation_encoder_hidden_size (in_features) = 32
    #   layer_sizes = [64, 32]  -> user_representation_size = 32
    #   n_movies = 256 (padded to one lane-dense 512-wide decoder tile)
    batch = 8
    in_features = 32
    layer_sizes = [64, 32]
    n_movies = 256

    key = jax.random.PRNGKey(0)
    k_x, k_w0, k_b0, k_w1, k_b1, k_wd, k_bd = jax.random.split(key, 7)

    # PyTorch Linear weights stored pre-transposed as (in, out) so the kernel
    # computes x @ W + b (== x @ weight.T + bias).
    x = jax.random.normal(k_x, (batch, in_features), dtype=jnp.float32)
    w0_f32 = 0.1 * jax.random.normal(k_w0, (in_features, layer_sizes[0]), dtype=jnp.float32)
    b0 = 0.1 * jax.random.normal(k_b0, (1, layer_sizes[0]), dtype=jnp.float32)
    w1_f32 = 0.1 * jax.random.normal(k_w1, (layer_sizes[0], layer_sizes[1]), dtype=jnp.float32)
    b1 = 0.1 * jax.random.normal(k_b1, (1, layer_sizes[1]), dtype=jnp.float32)
    wd_f32 = 0.1 * jax.random.normal(k_wd, (layer_sizes[1], n_movies), dtype=jnp.float32)
    bd = 0.1 * jax.random.normal(k_bd, (1, n_movies), dtype=jnp.float32)

    w0 = w0_f32.astype(jnp.bfloat16)
    w1 = w1_f32.astype(jnp.bfloat16)
    wd = wd_f32.astype(jnp.bfloat16)

    out = r_autorec_forward(x, w0, b0, w1, b1, wd, bd)
    out = jax.block_until_ready(out)
    assert out.shape == (batch, n_movies)
    assert out.dtype == jnp.bfloat16

    out_f32 = out.astype(jnp.float32)

    # (a) Mixed-precision reference (same operand dtypes as the kernel):
    ref_mixed = reference_forward_mixed(x, w0, b0, w1, b1, wd, bd)
    assert bool(jnp.allclose(out_f32, ref_mixed, atol=1.5e-2, rtol=1.5e-2)), (
        f"mixed-ref max abs diff {jnp.max(jnp.abs(out_f32 - ref_mixed))}")

    # (b) True f32 PyTorch semantics, looser tolerance (bf16 weights + bf16
    # output retain ~3 significant digits on scores in (0, 1)).
    ref_f32 = reference_forward_f32(x, w0_f32, b0, w1_f32, b1, wd_f32, bd)
    assert bool(jnp.allclose(out_f32, ref_f32, atol=4e-2, rtol=4e-2)), (
        f"f32-ref max abs diff {jnp.max(jnp.abs(out_f32 - ref_f32))}")

    # TODO(synk): ReviewRepTrainer (GenSen / RNN review encoder) precedes this MLP in
    # the full pipeline but is not part of R_AutoRec.forward, so it is not implemented.
    print("KERNEL_OK")
</pallas_src>

<mosaic_0001>
module attributes {stable_mosaic.version = 11 : i64} {
  func.func @r_autorec_kernel(%arg0: i32, %arg1: i32, %arg2: memref<16x32xf32, #tpu.memory_space<vmem>>, %arg3: memref<32x64xbf16, #tpu.memory_space<vmem>>, %arg4: memref<1x64xf32, #tpu.memory_space<vmem>>, %arg5: memref<64x32xbf16, #tpu.memory_space<vmem>>, %arg6: memref<1x32xf32, #tpu.memory_space<vmem>>, %arg7: memref<32x512xbf16, #tpu.memory_space<vmem>>, %arg8: memref<1x512xf32, #tpu.memory_space<vmem>>, %arg9: memref<16x512xbf16, #tpu.memory_space<vmem>>) attributes {dimension_semantics = [#tpu.dimension_semantics<parallel>, #tpu.dimension_semantics<parallel>], iteration_bounds = array<i64: 1, 1>, scalar_prefetch = 0 : i64, scratch_operands = 0 : i64, tpu.core_type = #tpu.core_type<tc>, window_params = [{transform_indices = @transform_0, window_bounds = array<i64: 16, 32>}, {pipeline_mode = #tpu.pipeline_mode<synchronous>, transform_indices = @transform_1, window_bounds = array<i64: 32, 64>}, {pipeline_mode = #tpu.pipeline_mode<synchronous>, transform_indices = @transform_2, window_bounds = array<i64: 1, 64>}, {pipeline_mode = #tpu.pipeline_mode<synchronous>, transform_indices = @transform_3, window_bounds = array<i64: 64, 32>}, {pipeline_mode = #tpu.pipeline_mode<synchronous>, transform_indices = @transform_4, window_bounds = array<i64: 1, 32>}, {transform_indices = @transform_5, window_bounds = array<i64: 32, 512>}, {transform_indices = @transform_6, window_bounds = array<i64: 1, 512>}, {transform_indices = @transform_7, window_bounds = array<i64: 16, 512>}]} {
    %c0 = arith.constant 0 : index
    %c0_0 = arith.constant 0 : index
    %0 = vector.load %arg2[%c0, %c0_0] : memref<16x32xf32, #tpu.memory_space<vmem>>, vector<16x32xf32>
    %1 = arith.truncf %0 : vector<16x32xf32> to vector<16x32xbf16>
    %c0_1 = arith.constant 0 : index
    %c0_2 = arith.constant 0 : index
    %2 = vector.load %arg3[%c0_1, %c0_2] : memref<32x64xbf16, #tpu.memory_space<vmem>>, vector<32x64xbf16>
    %cst = arith.constant dense<0.000000e+00> : vector<16x64xf32>
    %3 = tpu.matmul %1, %2, %cst {dimension_numbers = #tpu.dot_dimension_numbers<[1], [0], [0], [1], [0, 0, 1, 1], [], []>} : vector<16x32xbf16>, vector<32x64xbf16>, vector<16x64xf32> -> vector<16x64xf32>
    %c0_3 = arith.constant 0 : index
    %c0_4 = arith.constant 0 : index
    %4 = vector.load %arg4[%c0_3, %c0_4] : memref<1x64xf32, #tpu.memory_space<vmem>>, vector<1x64xf32>
    %5 = vector.broadcast %4 : vector<1x64xf32> to vector<16x64xf32>
    %6 = arith.addf %3, %5 : vector<16x64xf32>
    %7 = arith.negf %6 : vector<16x64xf32>
    %8 = math.exp %7 : vector<16x64xf32>
    %cst_5 = arith.constant 1.000000e+00 : f32
    %9 = vector.broadcast %cst_5 : f32 to vector<16x64xf32>
    %10 = arith.addf %9, %8 : vector<16x64xf32>
    %11 = arith.divf %9, %10 : vector<16x64xf32>
    %12 = arith.truncf %11 : vector<16x64xf32> to vector<16x64xbf16>
    %c0_6 = arith.constant 0 : index
    %c0_7 = arith.constant 0 : index
    %13 = vector.load %arg5[%c0_6, %c0_7] : memref<64x32xbf16, #tpu.memory_space<vmem>>, vector<64x32xbf16>
    %cst_8 = arith.constant dense<0.000000e+00> : vector<16x32xf32>
    %14 = tpu.matmul %12, %13, %cst_8 {dimension_numbers = #tpu.dot_dimension_numbers<[1], [0], [0], [1], [0, 0, 1, 1], [], []>} : vector<16x64xbf16>, vector<64x32xbf16>, vector<16x32xf32> -> vector<16x32xf32>
    %c0_9 = arith.constant 0 : index
    %c0_10 = arith.constant 0 : index
    %15 = vector.load %arg6[%c0_9, %c0_10] : memref<1x32xf32, #tpu.memory_space<vmem>>, vector<1x32xf32>
    %16 = vector.broadcast %15 : vector<1x32xf32> to vector<16x32xf32>
    %17 = arith.addf %14, %16 : vector<16x32xf32>
    %18 = arith.negf %17 : vector<16x32xf32>
    %19 = math.exp %18 : vector<16x32xf32>
    %cst_11 = arith.constant 1.000000e+00 : f32
    %20 = vector.broadcast %cst_11 : f32 to vector<16x32xf32>
    %21 = arith.addf %20, %19 : vector<16x32xf32>
    %22 = arith.divf %20, %21 : vector<16x32xf32>
    %23 = arith.truncf %22 : vector<16x32xf32> to vector<16x32xbf16>
    %c0_12 = arith.constant 0 : index
    %c0_13 = arith.constant 0 : index
    %24 = vector.load %arg7[%c0_12, %c0_13] : memref<32x512xbf16, #tpu.memory_space<vmem>>, vector<32x512xbf16>
    %cst_14 = arith.constant dense<0.000000e+00> : vector<16x512xf32>
    %25 = tpu.matmul %23, %24, %cst_14 {dimension_numbers = #tpu.dot_dimension_numbers<[1], [0], [0], [1], [0, 0, 1, 1], [], []>} : vector<16x32xbf16>, vector<32x512xbf16>, vector<16x512xf32> -> vector<16x512xf32>
    %c0_15 = arith.constant 0 : index
    %c0_16 = arith.constant 0 : index
    %26 = vector.load %arg8[%c0_15, %c0_16] : memref<1x512xf32, #tpu.memory_space<vmem>>, vector<1x512xf32>
    %27 = vector.broadcast %26 : vector<1x512xf32> to vector<16x512xf32>
    %28 = arith.addf %25, %27 : vector<16x512xf32>
    %29 = arith.negf %28 : vector<16x512xf32>
    %30 = math.exp %29 : vector<16x512xf32>
    %cst_17 = arith.constant 1.000000e+00 : f32
    %31 = vector.broadcast %cst_17 : f32 to vector<16x512xf32>
    %32 = arith.addf %31, %30 : vector<16x512xf32>
    %33 = arith.divf %31, %32 : vector<16x512xf32>
    %34 = arith.truncf %33 : vector<16x512xf32> to vector<16x512xbf16>
    %c0_18 = arith.constant 0 : index
    %c0_19 = arith.constant 0 : index
    %35 = vector.load %arg9[%c0_18, %c0_19] : memref<16x512xbf16, #tpu.memory_space<vmem>>, vector<16x512xbf16>
    tpu.vector_store %arg9[%c0_18, %c0_19], %34 {strides = array<i32>} : memref<16x512xbf16, #tpu.memory_space<vmem>>, vector<16x512xbf16>,
    return
  }
  func.func @transform_0(%arg0: i32, %arg1: i32) -> (i32, i32) {
    %c0_i32 = arith.constant 0 : i32
    %c0_i32_0 = arith.constant 0 : i32
    return %arg0, %c0_i32 : i32, i32
  }
  func.func @transform_1(%arg0: i32, %arg1: i32) -> (i32, i32) {
    %c0_i32 = arith.constant 0 : i32
    %c0_i32_0 = arith.constant 0 : i32
    %c0_i32_1 = arith.constant 0 : i32
    return %c0_i32, %c0_i32_0 : i32, i32
  }
  func.func @transform_2(%arg0: i32, %arg1: i32) -> (i32, i32) {
    %c0_i32 = arith.constant 0 : i32
    %c0_i32_0 = arith.constant 0 : i32
    %c0_i32_1 = arith.constant 0 : i32
    return %c0_i32, %c0_i32_0 : i32, i32
  }
  func.func @transform_3(%arg0: i32, %arg1: i32) -> (i32, i32) {
    %c0_i32 = arith.constant 0 : i32
    %c0_i32_0 = arith.constant 0 : i32
    %c0_i32_1 = arith.constant 0 : i32
    return %c0_i32, %c0_i32_0 : i32, i32
  }
  func.func @transform_4(%arg0: i32, %arg1: i32) -> (i32, i32) {
    %c0_i32 = arith.constant 0 : i32
    %c0_i32_0 = arith.constant 0 : i32
    %c0_i32_1 = arith.constant 0 : i32
    return %c0_i32, %c0_i32_0 : i32, i32
  }
  func.func @transform_5(%arg0: i32, %arg1: i32) -> (i32, i32) {
    %c0_i32 = arith.constant 0 : i32
    %c0_i32_0 = arith.constant 0 : i32
    return %c0_i32, %arg1 : i32, i32
  }
  func.func @transform_6(%arg0: i32, %arg1: i32) -> (i32, i32) {
    %c0_i32 = arith.constant 0 : i32
    %c0_i32_0 = arith.constant 0 : i32
    return %c0_i32, %arg1 : i32, i32
  }
  func.func @transform_7(%arg0: i32, %arg1: i32) -> (i32, i32) {
    %c0_i32 = arith.constant 0 : i32
    return %arg0, %arg1 : i32, i32
  }
}

</mosaic_0001>

<bundles_post_ra>
// kernel: _r_autorec_forward_impl.1
= control target key start
LH: loop header
LB: loop body
LE: loop exit
PB: predicated region body
PF: predicated region fallthrough
CT: control target
= control target key end

     0   :  { %vm50_vm0 = vcmask 261120   ;;  %vm143_vm9 = vcmask 523264   ;;  %s817_s1 = inlined_call_operand.vmem [shape: bf16[32,64], index: 1, kind: input, shape index: {}]   ;;  %s818_s0 = inlined_call_operand.vmem [shape: f32[16,32], index: 0, kind: input, shape index: {}]   ;;  %s819_s2 = inlined_call_operand.vmem [shape: f32[1,64], index: 2, kind: input, shape index: {}]   ;;  %s820_s4 = inlined_call_operand.vmem [shape: f32[1,32], index: 4, kind: input, shape index: {}]   ;;  %s821_s3 = inlined_call_operand.vmem [shape: bf16[64,32], index: 3, kind: input, shape index: {}]   ;;  %s822_s5 = inlined_call_operand.vmem [shape: bf16[32,512], index: 5, kind: input, shape index: {}]   ;;  %s823_s6 = inlined_call_operand.vmem [shape: f32[1,512], index: 6, kind: input, shape index: {}]   ;;  %s824_s7 = inlined_call_operand.vmem [shape: bf16[16,512], index: 7, kind: output, shape index: {}]  }
   0x1   :  { %v556_v0 = vld [vmem:[%s817_s1 + $0x8] sm:$0xff]  ;;  %v555_v1 = vld [vmem:[%s817_s1] sm:$0xff]  ;;  %v560_v5 = vld [vmem:[%s821_s3 + $0x18] sm:$0xff] }
   0x2   :  { %60 = vmatpush.bf16.msra.mxu0 %v556_v0  ;;  %v27_v2 = vld [vmem:[%s818_s0] sm:$0xff]  ;;  %v28_v3 = vld [vmem:[%s818_s0 + $0x8] sm:$0xff]  ;;  %151 = vmatpush.bf16.msra.mxu1 %v560_v5  ;;  %v559_v6 = vld [vmem:[%s821_s3 + $0x10] sm:$0xff] }
   0x3   :  { %v29_v4 = vpack.c.bf16 %v28_v3, %v27_v2  ;;  %v569_v7 = vld [vmem:[%s819_s2] ss:$0 sm:$0xff]  ;;  %v558_v8 = vld [vmem:[%s821_s3 + $0x8] sm:$0xff]  ;;  %v567_v43 = vld [vmem:[%s822_s5 + $0x2c] sm:$0xf0] }
   0x4   :  { %v557_v11 = vld [vmem:[%s821_s3] sm:$0xff]  ;;  %v531_v47 = vld [vmem:[%s822_s5 + $0x30] sm:$0xf0]  ;;  %v537_v48 = vld [vmem:[%s822_s5 + $0x28] sm:$0xf] }
   0x5   :  { %v570_v41 = vld [vmem:[%s820_s4] ss:$0 sm:$0xff]  ;;  %v565_v44 = vld [vmem:[%s822_s5 + $0x24] sm:$0xf]  ;;  %v568_v49 = vld [vmem:[%s822_s5 + $0x34] sm:$0xf0] }
   0x6   :  { %61 = vmatpush.bf16.msra.mxu0 %v555_v1  ;;  %152 = vmatpush.bf16.msra.mxu1 %v559_v6  ;;  %v529_v42 = vld [vmem:[%s822_s5 + $0x20] sm:$0xf]  ;;  %v534_v51 = vor.u32 %v565_v44, %v531_v47  ;;  %v538_v52 = vor.u32 %v568_v49, %v537_v48  ;;  %v563_v54 = vld [vmem:[%s822_s5 + $0xc] sm:$0xf0]  ;;  %v561_v55 = vld [vmem:[%s822_s5 + $0x4] sm:$0xf] }
   0x7   :  { %v530_v46 = vor.u32 %v567_v43, %v529_v42  ;;  %v513_v53 = vld [vmem:[%s822_s5] sm:$0xf]  ;;  %v515_v57 = vld [vmem:[%s822_s5 + $0x10] sm:$0xf0]  ;;  %v521_v58 = vld [vmem:[%s822_s5 + $0x8] sm:$0xf] }
   0x8   :  { %v514_v56 = vor.u32 %v563_v54, %v513_v53  ;;  %v564_v59 = vld [vmem:[%s822_s5 + $0x14] sm:$0xf0]  ;;  %281 = vmatpush.bf16.msra.mxu3 %v534_v51  ;;  %v518_v61 = vor.u32 %v561_v55, %v515_v57  ;;  %v566_v1 = vld [vmem:[%s822_s5 + $0x2c] sm:$0xf]  ;;  %v539_v2 = vld [vmem:[%s822_s5 + $0x38] sm:$0xf0] }
   0x9   :  { %489 = vmatmul.msk.bf16.vlgmr.msra.gmra.mxu0 %vm50_vm0, %v29_v4  ;;  %267 = vmatpush.bf16.msra.mxu2 %v530_v46  ;;  %v522_v62 = vor.u32 %v564_v59, %v521_v58  ;;  %v562_v3 = vld [vmem:[%s822_s5 + $0xc] sm:$0xf]  ;;  %v542_v6 = vor.u32 %v566_v1, %v539_v2 }
   0xa   :  { %153 = vmatpush.bf16.msra.mxu1 %v558_v8  ;;  %295 = vmatpush.bf16.msrb.mxu0 %v538_v52 }
   0xc   :  { %282 = vmatpush.bf16.msra.mxu3 %v518_v61 }
   0xd   :  { %268 = vmatpush.bf16.msra.mxu2 %v514_v56 }
   0xe   :  { %154 = vmatpush.bf16.msra.mxu1 %v557_v11  ;;  %296 = vmatpush.bf16.msrb.mxu0 %v522_v62 }
  0x11   :  { %309 = vmatpush.bf16.msrb.mxu2 %v542_v6 }
  0x86   :  { %v63_v9 = vpop.f32.mrf.mxu0 }
  0x87   :  { %v64_v10 = vadd.f32 %v569_v7, %v63_v9 }
  0x89   :  { %v490_v12 = vmul.f32 -1.442695, %v64_v10 }
  0x8b   :  { %571 = vpow2.f32 %v490_v12 }
  0x8e   :  { %v65_v13 = vpop.f32.mrf.mxu0 }
  0x8f   :  { %v66_v14 = vadd.f32 %v569_v7, %v65_v13  ;;  %v523_v7 = vld [vmem:[%s822_s5 + $0x18] sm:$0xf0] }
  0x90   :  { %v526_v9 = vor.u32 %v562_v3, %v523_v7 }
  0x91   :  { %v572_v15 = vpop.eup %571  ;;  %v491_v16 = vmul.f32 -1.442695, %v66_v14 }
  0x92   :  { %v74_v17 = vadd.f32 1.0, %v572_v15  ;;  %310 = vmatpush.bf16.msrb.mxu2 %v526_v9 }
  0x93   :  { %573 = vpow2.f32 %v491_v16 }
  0x94   :  { %575 = vrcp.f32 %v74_v17  ;;  %vm81_vm2 = vweird.f32 %v74_v17  ;;  %v87_v28 = vand.u32 2147483648, %v74_v17  ;;  %v85_v30 = vand.u32 2147483647, %v74_v17 }
  0x96   :  { %v88_v35 = vor.u32 1.1754944e-38, %v87_v28  ;;  %vm86_vm7 = vcmp.eq.f32.partialorder %v85_v30, 8.507059e+37 }
  0x99   :  { %v574_v18 = vpop.eup %573 }
  0x9a   :  { %v576_v19 = vpop.eup %575  ;;  %v75_v20 = vadd.f32 1.0, %v574_v18 }
  0x9b   :  { %v77_v21 = vmul.f32 %v576_v19, %v74_v17  ;;  %vm82_vm1 = vweird.f32 %v576_v19 }
  0x9c   :  { %577 = vrcp.f32 %v75_v20  ;;  %v102_v29 = vand.u32 2147483648, %v75_v20  ;;  %v100_v32 = vand.u32 2147483647, %v75_v20  ;;  %vm83_vm4 = vmor %vm81_vm2, %vm82_vm1  ;;  %vm96_vm5 = vweird.f32 %v75_v20 }
  0x9d   :  { %v78_v22 = vsub.f32 1.0, %v77_v21 }
  0x9e   :  { %v103_v36 = vor.u32 1.1754944e-38, %v102_v29  ;;  %vm101_vm8 = vcmp.eq.f32.partialorder %v100_v32, 8.507059e+37 }
  0x9f   :  { %v79_v23 = vmul.f32 %v576_v19, %v78_v22 }
  0xa1   :  { %v80_v26 = vadd.f32 %v576_v19, %v79_v23 }
  0xa2   :  { %v578_v24 = vpop.eup %577 }
  0xa3   :  { %v92_v25 = vmul.f32 %v578_v24, %v75_v20  ;;  %vm97_vm3 = vweird.f32 %v578_v24  ;;  %v84_v33 = vsel %vm83_vm4, %v576_v19, %v80_v26 }
  0xa4   :  { %vm98_vm6 = vmor %vm96_vm5, %vm97_vm3  ;;  %v89_v38 = vsel %vm86_vm7, %v88_v35, %v84_v33  ;;  %v745_v33 = vld [vmem:[%s823_s6] sm:$0xf] }
  0xa5   :  { %v93_v27 = vsub.f32 1.0, %v92_v25 }
  0xa7   :  { %v94_v31 = vmul.f32 %v578_v24, %v93_v27 }
  0xa9   :  { %v95_v34 = vadd.f32 %v578_v24, %v94_v31 }
  0xab   :  { %v99_v37 = vsel %vm98_vm6, %v578_v24, %v95_v34  ;;  %v212_v34 = vperm.slane %v745_v33, 2 }
  0xac   :  { %v104_v39 = vsel %vm101_vm8, %v103_v36, %v99_v37  ;;  %v210_v37 = vperm.slane %v745_v33, 0 }
  0xad   :  { %v106_v40 = vpack.c.bf16 %v104_v39, %v89_v38  ;;  %v211_v38 = vperm.slane %v745_v33, 1 }
  0xaf   :  { %508 = vmatmul.msk.bf16.vlgmr.msra.gmra.mxu1 %vm143_vm9, %v106_v40 }
 0x12c   :  { %v156_v45 = vpop.f32.mrf.mxu1 }
 0x12d   :  { %v157_v50 = vadd.f32 %v570_v41, %v156_v45 }
 0x12f   :  { %v509_v60 = vmul.f32 -1.442695, %v157_v50 }
 0x131   :  { %579 = vpow2.f32 %v509_v60  ;;  %v213_v60 = vperm.slane %v745_v33, 3 }
 0x134   :  { %v158_v63 = vpop.f32.mrf.mxu1 }
 0x135   :  { %v159_v0 = vadd.f32 %v570_v41, %v158_v63 }
 0x137   :  { %v580_v4 = vpop.eup %579  ;;  %v510_v5 = vmul.f32 -1.442695, %v159_v0 }
 0x138   :  { %v167_v8 = vadd.f32 1.0, %v580_v4 }
 0x139   :  { %581 = vpow2.f32 %v510_v5 }
 0x13a   :  { %583 = vrcp.f32 %v167_v8  ;;  %vm174_vm11 = vweird.f32 %v167_v8  ;;  %v180_v20 = vand.u32 2147483648, %v167_v8  ;;  %v178_v22 = vand.u32 2147483647, %v167_v8 }
 0x13c   :  { %v181_v27 = vor.u32 1.1754944e-38, %v180_v20  ;;  %vm179_vm1 = vcmp.eq.f32.partialorder %v178_v22, 8.507059e+37 }
 0x13f   :  { %v582_v10 = vpop.eup %581 }
 0x140   :  { %v584_v11 = vpop.eup %583  ;;  %v168_v12 = vadd.f32 1.0, %v582_v10 }
 0x141   :  { %v170_v13 = vmul.f32 %v584_v11, %v167_v8  ;;  %vm175_vm10 = vweird.f32 %v584_v11 }
 0x142   :  { %585 = vrcp.f32 %v168_v12  ;;  %v195_v21 = vand.u32 2147483648, %v168_v12  ;;  %v193_v24 = vand.u32 2147483647, %v168_v12  ;;  %vm176_vm13 = vmor %vm174_vm11, %vm175_vm10  ;;  %vm189_vm14 = vweird.f32 %v168_v12 }
 0x143   :  { %v171_v14 = vsub.f32 1.0, %v170_v13 }
 0x144   :  { %v196_v28 = vor.u32 1.1754944e-38, %v195_v21  ;;  %vm194_vm2 = vcmp.eq.f32.partialorder %v193_v24, 8.507059e+37 }
 0x145   :  { %v172_v15 = vmul.f32 %v584_v11, %v171_v14 }
 0x147   :  { %v173_v19 = vadd.f32 %v584_v11, %v172_v15 }
 0x148   :  { %v586_v16 = vpop.eup %585 }
 0x149   :  { %v185_v17 = vmul.f32 %v586_v16, %v168_v12  ;;  %vm190_vm12 = vweird.f32 %v586_v16  ;;  %v177_v25 = vsel %vm176_vm13, %v584_v11, %v173_v19 }
 0x14a   :  { %vm191_vm15 = vmor %vm189_vm14, %vm190_vm12  ;;  %v182_v30 = vsel %vm179_vm1, %v181_v27, %v177_v25 }
 0x14b   :  { %v186_v18 = vsub.f32 1.0, %v185_v17 }
 0x14d   :  { %v187_v23 = vmul.f32 %v586_v16, %v186_v18 }
 0x14f   :  { %v188_v26 = vadd.f32 %v586_v16, %v187_v23 }
 0x151   :  { %v192_v29 = vsel %vm191_vm15, %v586_v16, %v188_v26 }
 0x152   :  { %v197_v31 = vsel %vm194_vm2, %v196_v28, %v192_v29 }
 0x153   :  { %v199_v32 = vpack.c.bf16 %v197_v31, %v182_v30 }
 0x155   :  { %543 = vmatmul.msk.bf16.vlgmr.msra.gmra.mxu2 %vm50_vm0, %v199_v32  ;;  %544 = vmatmul.msk.bf16.vlgmr.msra.gmra.mxu3 %vm50_vm0, %v199_v32 }
 0x156   :  { %545 = vmatmul.msk.bf16.vlgmr.msrb.gmra.mxu0 %vm50_vm0, %v199_v32 }
 0x165   :  { %546 = vmatmul.msk.bf16.vlgmr.msrb.gmra.mxu2 %vm50_vm0, %v199_v32 }
 0x1d3   :  { %v298_v35 = vpop.f32.mrf.mxu0 }
 0x1d4   :  { %v299_v36 = vadd.f32 %v298_v35, %v212_v34 }
 0x1d6   :  { %v549_v39 = vmul.f32 -1.442695, %v299_v36 }
 0x1d8   :  { %v270_v40 = vpop.f32.mrf.mxu2  ;;  %v284_v41 = vpop.f32.mrf.mxu3  ;;  %587 = vpow2.f32 %v549_v39 }
 0x1d9   :  { %v271_v42 = vadd.f32 %v270_v40, %v210_v37  ;;  %v285_v43 = vadd.f32 %v284_v41, %v211_v38 }
 0x1db   :  { %v547_v44 = vmul.f32 -1.442695, %v271_v42  ;;  %v548_v45 = vmul.f32 -1.442695, %v285_v43  ;;  %v300_v46 = vpop.f32.mrf.mxu0 }
 0x1dc   :  { %v301_v47 = vadd.f32 %v300_v46, %v212_v34 }
 0x1dd   :  { %589 = vpow2.f32 %v547_v44 }
 0x1de   :  { %591 = vpow2.f32 %v548_v45  ;;  %v588_v50 = vpop.eup %587  ;;  %v553_v56 = vmul.f32 -1.442695, %v301_v47 }
 0x1df   :  { %v751_v61 = vadd.f32 1.0, %v588_v50 }
 0x1e0   :  { %v272_v48 = vpop.f32.mrf.mxu2  ;;  %v286_v49 = vpop.f32.mrf.mxu3 }
 0x1e1   :  { %v273_v51 = vadd.f32 %v272_v48, %v210_v37  ;;  %v287_v52 = vadd.f32 %v286_v49, %v211_v38  ;;  %vm384_vm10 = vweird.f32 %v751_v61  ;;  %v388_v43 = vand.u32 2147483647, %v751_v61 }
 0x1e2   :  { %v390_v44 = vand.u32 2147483648, %v751_v61 }
 0x1e3   :  { %v590_v53 = vpop.eup %589  ;;  %v551_v58 = vmul.f32 -1.442695, %v273_v51  ;;  %v552_v59 = vmul.f32 -1.442695, %v287_v52 }
 0x1e4   :  { %v592_v54 = vpop.eup %591  ;;  %v341_v55 = vadd.f32 1.0, %v590_v53 }
 0x1e5   :  { %v342_v57 = vadd.f32 1.0, %v592_v54 }
 0x1e6   :  { %593 = vrcp.f32 %v341_v55  ;;  %v358_v8 = vand.u32 2147483647, %v341_v55  ;;  %v360_v10 = vand.u32 2147483648, %v341_v55  ;;  %vm354_vm4 = vweird.f32 %v341_v55 }
 0x1e7   :  { %595 = vrcp.f32 %v342_v57  ;;  %v375_v12 = vand.u32 2147483648, %v342_v57  ;;  %v373_v20 = vand.u32 2147483647, %v342_v57  ;;  %vm369_vm5 = vweird.f32 %v342_v57 }
 0x1e8   :  { %597 = vpow2.f32 %v553_v56  ;;  %v312_v62 = vpop.f32.mrf.mxu2  ;;  %v361_v25 = vor.u32 1.1754944e-38, %v360_v10  ;;  %vm359_vm7 = vcmp.eq.f32.partialorder %v358_v8, 8.507059e+37 }
 0x1e9   :  { %599 = vpow2.f32 %v551_v58  ;;  %v313_v63 = vadd.f32 %v312_v62, %v213_v60  ;;  %v376_v28 = vor.u32 1.1754944e-38, %v375_v12  ;;  %vm374_vm9 = vcmp.eq.f32.partialorder %v373_v20, 8.507059e+37 }
 0x1ea   :  { %601 = vpow2.f32 %v552_v59 }
 0x1eb   :  { %603 = vrcp.f32 %v751_v61  ;;  %v550_v1 = vmul.f32 -1.442695, %v313_v63 }
 0x1ec   :  { %v594_v0 = vpop.eup %593 }
 0x1ed   :  { %v596_v2 = vpop.eup %595  ;;  %v350_v3 = vmul.f32 %v594_v0, %v341_v55  ;;  %605 = vpow2.f32 %v550_v1  ;;  %vm355_vm0 = vweird.f32 %v594_v0 }
 0x1ee   :  { %v598_v4 = vpop.eup %597  ;;  %v365_v5 = vmul.f32 %v596_v2, %v342_v57  ;;  %vm370_vm3 = vweird.f32 %v596_v2  ;;  %vm356_vm6 = vmor %vm354_vm4, %vm355_vm0 }
 0x1ef   :  { %v600_v6 = vpop.eup %599  ;;  %v351_v7 = vsub.f32 1.0, %v350_v3  ;;  %v758_v17 = vadd.f32 1.0, %v598_v4  ;;  %vm371_vm8 = vmor %vm369_vm5, %vm370_vm3 }
 0x1f0   :  { %v602_v9 = vpop.eup %601  ;;  %v366_v11 = vsub.f32 1.0, %v365_v5  ;;  %v754_v13 = vadd.f32 1.0, %v600_v6  ;;  %v314_v14 = vpop.f32.mrf.mxu2 }
 0x1f1   :  { %v756_v15 = vpop.eup %603  ;;  %v352_v16 = vmul.f32 %v594_v0, %v351_v7  ;;  %v760_v18 = vadd.f32 1.0, %v602_v9  ;;  %v315_v22 = vadd.f32 %v314_v14, %v213_v60 }
 0x1f2   :  { %v367_v19 = vmul.f32 %v596_v2, %v366_v11  ;;  %607 = vrcp.f32 %v754_v13  ;;  %v380_v24 = vmul.f32 %v756_v15, %v751_v61  ;;  %v420_v45 = vand.u32 2147483648, %v754_v13 }
 0x1f3   :  { %v353_v21 = vadd.f32 %v594_v0, %v352_v16  ;;  %v606_v23 = vpop.eup %605  ;;  %609 = vrcp.f32 %v760_v18  ;;  %v554_v33 = vmul.f32 -1.442695, %v315_v22  ;;  %v418_v47 = vand.u32 2147483647, %v754_v13 }
 0x1f4   :  { %v368_v26 = vadd.f32 %v596_v2, %v367_v19  ;;  %611 = vrcp.f32 %v758_v17  ;;  %v768_v32 = vadd.f32 1.0, %v606_v23  ;;  %v381_v35 = vsub.f32 1.0, %v380_v24 }
 0x1f5   :  { %v357_v27 = vsel %vm356_vm6, %v594_v0, %v353_v21  ;;  %vm385_vm12 = vweird.f32 %v756_v15  ;;  %vm414_vm13 = vweird.f32 %v754_v13  ;;  %v435_v50 = vand.u32 2147483648, %v760_v18 }
 0x1f6   :  { %v362_v29 = vsel %vm359_vm7, %v361_v25, %v357_v27  ;;  %v372_v30 = vsel %vm371_vm8, %v596_v2, %v368_v26  ;;  %613 = vrcp.f32 %v768_v32  ;;  %v382_v42 = vmul.f32 %v756_v15, %v381_v35  ;;  %vm386_vm5 = vmor %vm384_vm10, %vm385_vm12 }
 0x1f7   :  { %v377_v31 = vsel %vm374_vm9, %v376_v28, %v372_v30  ;;  %615 = vpow2.f32 %v554_v33  ;;  %v433_v54 = vand.u32 2147483647, %v760_v18  ;;  %v421_v57 = vor.u32 1.1754944e-38, %v420_v45 }
 0x1f8   :  { %v608_v34 = vpop.eup %607  ;;  %v469_v36 = vpack.c.bf16 %v377_v31, %v362_v29  ;;  %v383_v56 = vadd.f32 %v756_v15, %v382_v42  ;;  %vm429_vm1 = vweird.f32 %v760_v18  ;;  %vm419_vm2 = vcmp.eq.f32.partialorder %v418_v47, 8.507059e+37 }
 0x1f9   :  { %v410_v37 = vmul.f32 %v608_v34, %v754_v13  ;;  %v610_v38 = vpop.eup %609  ;;  %vm415_vm11 = vweird.f32 %v608_v34  ;;  %v436_v1 = vor.u32 1.1754944e-38, %v435_v50  ;;  %vm434_vm3 = vcmp.eq.f32.partialorder %v433_v54, 8.507059e+37 }
 0x1fa   :  { %473 = vst [vmem:[%s824_s7] sm:$0xff] %v469_v36  ;;  %v775_v39 = vpop.eup %611  ;;  %v425_v41 = vmul.f32 %v610_v38, %v760_v18  ;;  %vm430_vm14 = vweird.f32 %v610_v38  ;;  %vm416_vm15 = vmor %vm414_vm13, %vm415_vm11  ;;  %v405_v4 = vand.u32 2147483648, %v768_v32  ;;  %v403_v7 = vand.u32 2147483647, %v768_v32 }
 0x1fb   :  { %v411_v40 = vsub.f32 1.0, %v410_v37  ;;  %v440_v49 = vmul.f32 %v775_v39, %v758_v17  ;;  %vm431_vm0 = vmor %vm429_vm1, %vm430_vm14  ;;  %v387_v9 = vsel %vm386_vm5, %v756_v15, %v383_v56  ;;  %vm399_vm6 = vweird.f32 %v768_v32 }
 0x1fc   :  { %v426_v48 = vsub.f32 1.0, %v425_v41  ;;  %v614_v51 = vpop.eup %613  ;;  %v391_v11 = vor.u32 1.1754944e-38, %v390_v44  ;;  %v406_v12 = vor.u32 1.1754944e-38, %v405_v4  ;;  %vm389_vm8 = vcmp.eq.f32.partialorder %v388_v43, 8.507059e+37 }
 0x1fd   :  { %v412_v46 = vmul.f32 %v608_v34, %v411_v40  ;;  %v616_v55 = vpop.eup %615  ;;  %v395_v58 = vmul.f32 %v614_v51, %v768_v32  ;;  %v441_v63 = vsub.f32 1.0, %v440_v49  ;;  %vm400_vm4 = vweird.f32 %v614_v51 }
 0x1fe   :  { %v427_v53 = vmul.f32 %v610_v38, %v426_v48  ;;  %v348_v62 = vadd.f32 1.0, %v616_v55  ;;  %vm401_vm7 = vmor %vm399_vm6, %vm400_vm4  ;;  %vm404_vm9 = vcmp.eq.f32.partialorder %v403_v7, 8.507059e+37  ;;  %v392_v16 = vsel %vm389_vm8, %v391_v11, %v387_v9 }
 0x1ff   :  { %v413_v52 = vadd.f32 %v608_v34, %v412_v46  ;;  %v396_v2 = vsub.f32 1.0, %v395_v58  ;;  %v442_v13 = vmul.f32 %v775_v39, %v441_v63  ;;  %vm445_vm10 = vweird.f32 %v775_v39 }
 0x200   :  { %v428_v60 = vadd.f32 %v610_v38, %v427_v53  ;;  %617 = vrcp.f32 %v348_v62  ;;  %vm444_vm11 = vweird.f32 %v758_v17  ;;  %v450_v22 = vand.u32 2147483648, %v758_v17 }
 0x201   :  { %v417_v59 = vsel %vm416_vm15, %v608_v34, %v413_v52  ;;  %v397_v6 = vmul.f32 %v614_v51, %v396_v2  ;;  %v443_v20 = vadd.f32 %v775_v39, %v442_v13  ;;  %v465_v23 = vand.u32 2147483648, %v348_v62  ;;  %vm446_vm13 = vmor %vm444_vm11, %vm445_vm10 }
 0x202   :  { %v422_v0 = vsel %vm419_vm2, %v421_v57, %v417_v59  ;;  %v432_v3 = vsel %vm431_vm0, %v610_v38, %v428_v60  ;;  %v448_v24 = vand.u32 2147483647, %v758_v17  ;;  %v463_v26 = vand.u32 2147483647, %v348_v62 }
 0x203   :  { %v437_v5 = vsel %vm434_vm3, %v436_v1, %v432_v3  ;;  %v398_v10 = vadd.f32 %v614_v51, %v397_v6  ;;  %v447_v27 = vsel %vm446_vm13, %v775_v39, %v443_v20  ;;  %vm459_vm14 = vweird.f32 %v348_v62 }
 0x204   :  { %v471_v8 = vpack.c.bf16 %v437_v5, %v422_v0  ;;  %v451_v29 = vor.u32 1.1754944e-38, %v450_v22  ;;  %v466_v30 = vor.u32 1.1754944e-38, %v465_v23  ;;  %vm449_vm1 = vcmp.eq.f32.partialorder %v448_v24, 8.507059e+37 }
 0x205   :  { %v402_v14 = vsel %vm401_vm7, %v614_v51, %v398_v10  ;;  %vm464_vm2 = vcmp.eq.f32.partialorder %v463_v26, 8.507059e+37 }
 0x206   :  { %475 = vst [vmem:[%s824_s7 + $0x10] sm:$0xff] %v471_v8  ;;  %v618_v61 = vpop.eup %617  ;;  %v407_v18 = vsel %vm404_vm9, %v406_v12, %v402_v14  ;;  %v452_v32 = vsel %vm449_vm1, %v451_v29, %v447_v27 }
 0x207   :  { %v470_v19 = vpack.c.bf16 %v407_v18, %v392_v16  ;;  %v455_v15 = vmul.f32 %v618_v61, %v348_v62  ;;  %vm460_vm12 = vweird.f32 %v618_v61 }
 0x208   :  { %vm461_vm15 = vmor %vm459_vm14, %vm460_vm12 }
 0x209   :  { %474 = vst [vmem:[%s824_s7 + $0x8] sm:$0xff] %v470_v19  ;;  %v456_v21 = vsub.f32 1.0, %v455_v15 }
 0x20b   :  { %v457_v25 = vmul.f32 %v618_v61, %v456_v21 }
 0x20d   :  { %v458_v28 = vadd.f32 %v618_v61, %v457_v25 }
 0x20f   :  { %v462_v31 = vsel %vm461_vm15, %v618_v61, %v458_v28 }
 0x210   :  { %v467_v33 = vsel %vm464_vm2, %v466_v30, %v462_v31 }
 0x211   :  { %v472_v34 = vpack.c.bf16 %v467_v33, %v452_v32 }
 0x213   :  { %476 = vst [vmem:[%s824_s7 + $0x18] sm:$0xff] %v472_v34 }

</bundles_post_ra>
